<compile_context>
chip_gen: v6e
topology: v6e:2x2x1
jax: 0.10.0
libtpu: 0.0.40
codegen_flags: <defaults>
</compile_context>

<pallas_src>
import jax
import jax.numpy as jnp
from jax.experimental import pallas as pl
from jax.experimental.pallas import tpu as pltpu


def _round_up(x, m):
    return (x + m - 1) // m * m


def clip_mlp_kernel(x_ref, enc_w_ref, enc_b_ref, fc_w_ref, fc_b_ref,
                    out_ref, acc_ref):
    k = pl.program_id(1)

    # ---- init accumulator once per batch tile ----
    @pl.when(k == 0)
    def _():
        acc_ref[...] = jnp.zeros_like(acc_ref)

    # ---- synthetic image encoder matmul (stand-in for clip_model.visual) ----
    # bf16 x bf16 on the MXU, f32 accumulate into VMEM scratch.
    acc_ref[...] += jnp.dot(x_ref[...], enc_w_ref[...],
                            preferred_element_type=jnp.float32)

    # ---- finalize: bias add + MLPLearner.fc, once per batch tile ----
    @pl.when(k == pl.num_programs(1) - 1)
    def _():
        feats = acc_ref[...] + enc_b_ref[...].astype(jnp.float32)    # (TB, Dp)
        # CLIP runs the visual tower in half precision -> cast features once.
        feats = feats.astype(jnp.bfloat16)
        # fc: nn.Linear(image_proj_dim, n_class) — tiny, kept out of the K loop.
        logits = jnp.dot(feats, fc_w_ref[...],
                         preferred_element_type=jnp.float32)         # (TB, Np)
        logits = logits + fc_b_ref[...].astype(jnp.float32)
        out_ref[...] = logits.astype(out_ref.dtype)                  # lane-dense store


def prepare_clip_mlp_params(enc_w, enc_b, fc_w, fc_b, *, tk=None, lane_pad=256):
    """One-time parameter padding (hoisted out of the per-call wrapper).

    enc_w: (CHW, D), enc_b: (D,), fc_w: (D, n_class) pre-transposed, fc_b: (n_class,).
    Pads K to a multiple of tk, and D / n_class to multiples of `lane_pad`
    (256 -> full MXU pass on v6e/v7x, still legal on v5e).
    """
    CHW, D = enc_w.shape
    n_class = fc_w.shape[1]

    if tk is None:
        tk = min(1024, _round_up(CHW, 256))   # K tile, multiple of 256
    Kp = _round_up(CHW, tk)
    Dp = _round_up(D, lane_pad)
    Np = _round_up(n_class, lane_pad)

    enc_wp = jnp.zeros((Kp, Dp), jnp.bfloat16).at[:CHW, :D].set(
        enc_w.astype(jnp.bfloat16))
    enc_bp = jnp.zeros((1, Dp), jnp.bfloat16).at[:, :D].set(
        enc_b.reshape(1, -1).astype(jnp.bfloat16))
    fc_wp = jnp.zeros((Dp, Np), jnp.bfloat16).at[:D, :n_class].set(
        fc_w.astype(jnp.bfloat16))
    fc_bp = jnp.zeros((1, Np), jnp.bfloat16).at[:, :n_class].set(
        fc_b.reshape(1, -1).astype(jnp.bfloat16))

    return dict(enc_w=enc_wp, enc_b=enc_bp, fc_w=fc_wp, fc_b=fc_bp,
                CHW=CHW, D=D, n_class=n_class, tk=tk, Kp=Kp, Dp=Dp, Np=Np)


def _choose_batch_tile(B):
    """Batch tile: big (MXU-sized), multiple of 16 (bf16 sublane packing),
    and split into >= 2 tiles when possible so the 'parallel' grid axis can
    be sharded across the two v7x TensorCores."""
    Bp_min = _round_up(max(B, 16), 16)
    tb = min(256, Bp_min)
    if Bp_min // tb < 2 and Bp_min >= 32:
        tb = _round_up((Bp_min + 1) // 2, 16)
    Bp = _round_up(Bp_min, tb)
    return tb, Bp


def custom_clip_forward(image, params):
    """image: (B, C, H, W) NCHW (any float dtype).  Returns bf16 logits (B, n_class)."""
    CHW, n_class = params["CHW"], params["n_class"]
    tk, Kp, Dp, Np = params["tk"], params["Kp"], params["Dp"], params["Np"]
    enc_wp, enc_bp = params["enc_w"], params["enc_b"]
    fc_wp, fc_bp = params["fc_w"], params["fc_b"]

    B = image.shape[0]
    tb, Bp = _choose_batch_tile(B)

    # Glue: flatten NCHW, cast to half precision, pad (single pad op; weights
    # were padded once at init).
    x = image.reshape(B, -1).astype(jnp.bfloat16)
    assert x.shape[1] == CHW
    xp = jnp.pad(x, ((0, Bp - B), (0, Kp - CHW)))

    grid = (Bp // tb, Kp // tk)   # (batch tiles [parallel], K tiles [reduction, last])
    n_btiles = grid[0]

    # VMEM budget: double-buffered tiles + resident weights + f32 accumulator.
    vmem_need = (2 * tb * tk * 2          # x tiles (bf16)
                 + 2 * tk * Dp * 2        # enc_w tiles
                 + 2 * Dp * 2             # enc bias
                 + 2 * Dp * Np * 2        # fc weight (resident, double buffered)
                 + 2 * Np * 2             # fc bias
                 + 2 * tb * Np * 2        # output tiles
                 + tb * Dp * 4)           # f32 accumulator scratch
    vmem_limit = int(min(max(2 * vmem_need, 32 * 1024 * 1024), 64 * 1024 * 1024))

    # HBM traffic: x once, enc_w re-streamed once per batch tile (its index_map
    # depends only on k), resident weights once per batch tile, output once.
    cost = pl.CostEstimate(
        flops=2 * Bp * Kp * Dp + 2 * Bp * Dp * Np,
        transcendentals=0,
        bytes_accessed=int(xp.size * 2
                           + n_btiles * enc_wp.size * 2
                           + n_btiles * (enc_bp.size + fc_wp.size + fc_bp.size) * 2
                           + Bp * Np * 2),
    )

    out = pl.pallas_call(
        clip_mlp_kernel,
        out_shape=jax.ShapeDtypeStruct((Bp, Np), jnp.bfloat16),
        grid_spec=pltpu.PrefetchScalarGridSpec(
            num_scalar_prefetch=0,
            grid=grid,
            in_specs=[
                pl.BlockSpec((tb, tk), lambda i, k: (i, k)),   # x tile
                pl.BlockSpec((tk, Dp), lambda i, k: (k, 0)),   # enc_w tile (streamed over K)
                pl.BlockSpec((1, Dp), lambda i, k: (0, 0)),    # enc bias (resident)
                pl.BlockSpec((Dp, Np), lambda i, k: (0, 0)),   # fc weight (resident)
                pl.BlockSpec((1, Np), lambda i, k: (0, 0)),    # fc bias (resident)
            ],
            out_specs=pl.BlockSpec((tb, Np), lambda i, k: (i, 0)),
            scratch_shapes=[pltpu.VMEM((tb, Dp), jnp.float32)],
        ),
        compiler_params=pltpu.CompilerParams(
            dimension_semantics=("parallel", "arbitrary"),
            vmem_limit_bytes=vmem_limit),
        cost_estimate=cost,
    )(xp, enc_wp, enc_bp, fc_wp, fc_bp)

    return out[:B, :n_class]


if __name__ == "__main__":
    # Small shapes consistent with the module's forward:
    #   image: (B, 3, H, W); image_proj_dim D; n_class classes.
    B, C, H, W = 2, 3, 16, 16
    D = 32          # image_proj_dim (clip_model.text_projection.size(-1))
    n_class = 8     # len(classnames)

    key = jax.random.PRNGKey(0)
    k_img, k_ew, k_eb, k_fw, k_fb = jax.random.split(key, 5)

    image = jax.random.normal(k_img, (B, C, H, W), dtype=jnp.float32)

    # Deterministic synthetic parameters (bf16 = TPU-native half precision).
    enc_w = (jax.random.normal(k_ew, (C * H * W, D)) * 0.02).astype(jnp.bfloat16)
    enc_b = (jax.random.normal(k_eb, (D,)) * 0.02).astype(jnp.bfloat16)
    # fc: nn.Linear(D, n_class).half() — stored here pre-transposed as (D, n_class)
    fc_w = (jax.random.normal(k_fw, (D, n_class)) * (1.0 / jnp.sqrt(D))).astype(jnp.bfloat16)
    fc_b = (jax.random.normal(k_fb, (n_class,)) * 0.01).astype(jnp.bfloat16)

    # One-time weight padding (hoisted out of the forward path).
    params = prepare_clip_mlp_params(enc_w, enc_b, fc_w, fc_b)

    logits = custom_clip_forward(image, params)
    jax.block_until_ready(logits)

    # Reference check in plain JAX (same math: bf16 operands, f32 accumulate).
    x_bf = image.reshape(B, -1).astype(jnp.bfloat16)
    feats_ref = (jnp.dot(x_bf, enc_w, preferred_element_type=jnp.float32)
                 + enc_b.reshape(1, -1).astype(jnp.float32)).astype(jnp.bfloat16)
    logits_ref = (jnp.dot(feats_ref, fc_w, preferred_element_type=jnp.float32)
                  + fc_b.reshape(1, -1).astype(jnp.float32)).astype(jnp.bfloat16)

    assert logits.shape == (B, n_class) and logits.dtype == jnp.bfloat16
    assert jnp.allclose(logits.astype(jnp.float32),
                        logits_ref.astype(jnp.float32), atol=2e-2, rtol=2e-2)

    print("KERNEL_OK")
</pallas_src>

<mosaic_0001>
module attributes {stable_mosaic.version = 11 : i64} {
  func.func @clip_mlp_kernel(%arg0: i32, %arg1: i32, %arg2: memref<16x768xbf16, #tpu.memory_space<vmem>>, %arg3: memref<768x256xbf16, #tpu.memory_space<vmem>>, %arg4: memref<1x256xbf16, #tpu.memory_space<vmem>>, %arg5: memref<256x256xbf16, #tpu.memory_space<vmem>>, %arg6: memref<1x256xbf16, #tpu.memory_space<vmem>>, %arg7: memref<16x256xbf16, #tpu.memory_space<vmem>>, %arg8: memref<16x256xf32, #tpu.memory_space<vmem>>) attributes {dimension_semantics = [#tpu.dimension_semantics<parallel>, #tpu.dimension_semantics<arbitrary>], iteration_bounds = array<i64: 1, 1>, scalar_prefetch = 0 : i64, scratch_operands = 1 : i64, tpu.core_type = #tpu.core_type<tc>, window_params = [{transform_indices = @transform_0, window_bounds = array<i64: 16, 768>}, {transform_indices = @transform_1, window_bounds = array<i64: 768, 256>}, {pipeline_mode = #tpu.pipeline_mode<synchronous>, transform_indices = @transform_2, window_bounds = array<i64: 1, 256>}, {pipeline_mode = #tpu.pipeline_mode<synchronous>, transform_indices = @transform_3, window_bounds = array<i64: 256, 256>}, {pipeline_mode = #tpu.pipeline_mode<synchronous>, transform_indices = @transform_4, window_bounds = array<i64: 1, 256>}, {transform_indices = @transform_5, window_bounds = array<i64: 16, 256>}]} {
    %c0_i32 = arith.constant 0 : i32
    %0 = arith.cmpi eq, %arg1, %c0_i32 : i32
    %1 = arith.extui %0 : i1 to i32
    %c0_i32_0 = arith.constant 0 : i32
    %2 = arith.cmpi ne, %1, %c0_i32_0 : i32
    scf.if %2 {
      %cst_10 = arith.constant 0.000000e+00 : f32
      %12 = vector.broadcast %cst_10 : f32 to vector<16x256xf32>
      %c0_11 = arith.constant 0 : index
      %c0_12 = arith.constant 0 : index
      %13 = vector.load %arg8[%c0_11, %c0_12] : memref<16x256xf32, #tpu.memory_space<vmem>>, vector<16x256xf32>
      tpu.vector_store %arg8[%c0_11, %c0_12], %12 {strides = array<i32>} : memref<16x256xf32, #tpu.memory_space<vmem>>, vector<16x256xf32>,
    } else {
    }
    %c0 = arith.constant 0 : index
    %c0_1 = arith.constant 0 : index
    %3 = vector.load %arg8[%c0, %c0_1] : memref<16x256xf32, #tpu.memory_space<vmem>>, vector<16x256xf32>
    %c0_2 = arith.constant 0 : index
    %c0_3 = arith.constant 0 : index
    %4 = vector.load %arg2[%c0_2, %c0_3] : memref<16x768xbf16, #tpu.memory_space<vmem>>, vector<16x768xbf16>
    %c0_4 = arith.constant 0 : index
    %c0_5 = arith.constant 0 : index
    %5 = vector.load %arg3[%c0_4, %c0_5] : memref<768x256xbf16, #tpu.memory_space<vmem>>, vector<768x256xbf16>
    %cst = arith.constant dense<0.000000e+00> : vector<16x256xf32>
    %6 = tpu.matmul %4, %5, %cst {dimension_numbers = #tpu.dot_dimension_numbers<[1], [0], [0], [1], [0, 0, 1, 1], [], []>} : vector<16x768xbf16>, vector<768x256xbf16>, vector<16x256xf32> -> vector<16x256xf32>
    %7 = arith.addf %3, %6 : vector<16x256xf32>
    %c0_6 = arith.constant 0 : index
    %c0_7 = arith.constant 0 : index
    %8 = vector.load %arg8[%c0_6, %c0_7] : memref<16x256xf32, #tpu.memory_space<vmem>>, vector<16x256xf32>
    tpu.vector_store %arg8[%c0_6, %c0_7], %7 {strides = array<i32>} : memref<16x256xf32, #tpu.memory_space<vmem>>, vector<16x256xf32>,
    %c0_i32_8 = arith.constant 0 : i32
    %9 = arith.cmpi eq, %arg1, %c0_i32_8 : i32
    %10 = arith.extui %9 : i1 to i32
    %c0_i32_9 = arith.constant 0 : i32
    %11 = arith.cmpi ne, %10, %c0_i32_9 : i32
    scf.if %11 {
      %c0_10 = arith.constant 0 : index
      %c0_11 = arith.constant 0 : index
      %12 = vector.load %arg8[%c0_10, %c0_11] : memref<16x256xf32, #tpu.memory_space<vmem>>, vector<16x256xf32>
      %c0_12 = arith.constant 0 : index
      %c0_13 = arith.constant 0 : index
      %13 = vector.load %arg4[%c0_12, %c0_13] : memref<1x256xbf16, #tpu.memory_space<vmem>>, vector<1x256xbf16>
      %14 = arith.extf %13 : vector<1x256xbf16> to vector<1x256xf32>
      %15 = vector.broadcast %14 : vector<1x256xf32> to vector<16x256xf32>
      %16 = arith.addf %12, %15 : vector<16x256xf32>
      %17 = arith.truncf %16 : vector<16x256xf32> to vector<16x256xbf16>
      %c0_14 = arith.constant 0 : index
      %c0_15 = arith.constant 0 : index
      %18 = vector.load %arg5[%c0_14, %c0_15] : memref<256x256xbf16, #tpu.memory_space<vmem>>, vector<256x256xbf16>
      %cst_16 = arith.constant dense<0.000000e+00> : vector<16x256xf32>
      %19 = tpu.matmul %17, %18, %cst_16 {dimension_numbers = #tpu.dot_dimension_numbers<[1], [0], [0], [1], [0, 0, 1, 1], [], []>} : vector<16x256xbf16>, vector<256x256xbf16>, vector<16x256xf32> -> vector<16x256xf32>
      %c0_17 = arith.constant 0 : index
      %c0_18 = arith.constant 0 : index
      %20 = vector.load %arg6[%c0_17, %c0_18] : memref<1x256xbf16, #tpu.memory_space<vmem>>, vector<1x256xbf16>
      %21 = arith.extf %20 : vector<1x256xbf16> to vector<1x256xf32>
      %22 = vector.broadcast %21 : vector<1x256xf32> to vector<16x256xf32>
      %23 = arith.addf %19, %22 : vector<16x256xf32>
      %24 = arith.truncf %23 : vector<16x256xf32> to vector<16x256xbf16>
      %c0_19 = arith.constant 0 : index
      %c0_20 = arith.constant 0 : index
      %25 = vector.load %arg7[%c0_19, %c0_20] : memref<16x256xbf16, #tpu.memory_space<vmem>>, vector<16x256xbf16>
      tpu.vector_store %arg7[%c0_19, %c0_20], %24 {strides = array<i32>} : memref<16x256xbf16, #tpu.memory_space<vmem>>, vector<16x256xbf16>,
    } else {
    }
    return
  }
  func.func @transform_0(%arg0: i32, %arg1: i32) -> (i32, i32) {
    %c0_i32 = arith.constant 0 : i32
    return %arg0, %arg1 : i32, i32
  }
  func.func @transform_1(%arg0: i32, %arg1: i32) -> (i32, i32) {
    %c0_i32 = arith.constant 0 : i32
    %c0_i32_0 = arith.constant 0 : i32
    return %arg1, %c0_i32 : i32, i32
  }
  func.func @transform_2(%arg0: i32, %arg1: i32) -> (i32, i32) {
    %c0_i32 = arith.constant 0 : i32
    %c0_i32_0 = arith.constant 0 : i32
    %c0_i32_1 = arith.constant 0 : i32
    return %c0_i32, %c0_i32_0 : i32, i32
  }
  func.func @transform_3(%arg0: i32, %arg1: i32) -> (i32, i32) {
    %c0_i32 = arith.constant 0 : i32
    %c0_i32_0 = arith.constant 0 : i32
    %c0_i32_1 = arith.constant 0 : i32
    return %c0_i32, %c0_i32_0 : i32, i32
  }
  func.func @transform_4(%arg0: i32, %arg1: i32) -> (i32, i32) {
    %c0_i32 = arith.constant 0 : i32
    %c0_i32_0 = arith.constant 0 : i32
    %c0_i32_1 = arith.constant 0 : i32
    return %c0_i32, %c0_i32_0 : i32, i32
  }
  func.func @transform_5(%arg0: i32, %arg1: i32) -> (i32, i32) {
    %c0_i32 = arith.constant 0 : i32
    %c0_i32_0 = arith.constant 0 : i32
    return %arg0, %c0_i32 : i32, i32
  }
}

</mosaic_0001>

<bundles_post_ra>
// kernel: tpu_custom_call.1
= control target key start
LH: loop header
LB: loop body
LE: loop exit
PB: predicated region body
PF: predicated region fallthrough
CT: control target
= control target key end

     0   :  { %10 = vsyncpa [#allocation4], 0  ;;  %s1643_s0 = inlined_call_operand.hbm [shape: bf16[16,768], index: 0, kind: input, shape index: {}]   ;;  %s1644_s1 = inlined_call_operand.hbm [shape: bf16[768,256], index: 1, kind: input, shape index: {}]   ;;  %s1645_s2 = inlined_call_operand.vmem [shape: bf16[1,256], index: 2, kind: input, shape index: {}]   ;;  %s1646_s3 = inlined_call_operand.hbm [shape: bf16[256,256], index: 3, kind: input, shape index: {}]   ;;  %s1647_s4 = inlined_call_operand.vmem [shape: bf16[1,256], index: 4, kind: input, shape index: {}]   ;;  %s1648_s5 = inlined_call_operand.hbm [shape: bf16[16,256], index: 5, kind: output, shape index: {}]  }
   0x1   :  { %11 = vsyncpa [#allocation7], 0 }
   0x2   :  { %12 = vsyncpa [#allocation5], 0  ;;  %s1578_s18 = smov [#allocation6]  }
   0x3   :  { %s30_s19 = sshll.u32 %s1578_s18, 4  ;;  %s31_s19 = int_to_ptr.vmem [resolvable:$true] %s30_s19 }
   0x4   :  { %s1500_s20 = scalar_lea.vmem %s31_s19, 12288  ;;  %p1505_p1 = scmp.lt.s32.totalorder %s31_s19, %s31_s19 }
   0x5   :  { %p1501_p0 = scmp.ne.s32.totalorder %s31_s19, %s1500_s20  ;;  %p1506_p2 = scmp.lt.s32.totalorder %s1500_s20, %s1500_s20 }
   0x7   :  { %p1507_p3 = por %p1506_p2, %p1505_p1 }
   0x9   :  { %p1508_p4 = pnand %p1507_p3, %p1501_p0 }
   0xb   :  { %1511 = shalt.err (!%p1508_p4)
}
   0xc   :  { %s1579_s21 = smov 128   ;;  %s1580_s22 = smov 8  }
   0xd   :  { %36 = dma.hbm_to_vmem [thread:$0]  %s1644_s1, 12288, %s31_s19, [#allocation7], %s1579_s21, %s1579_s21, %s1580_s22  }
   0xe   :  { %s1581_s25 = smov [#allocation3]  }
   0xf   :  { %s18_s26 = sshll.u32 %s1581_s25, 4  ;;  %s19_s26 = int_to_ptr.vmem [resolvable:$true] %s18_s26 }
  0x10   :  { %s1520_s27 = scalar_lea.vmem %s19_s26, 768  ;;  %p1525_p6 = scmp.lt.s32.totalorder %s19_s26, %s19_s26 }
  0x11   :  { %p1521_p5 = scmp.ne.s32.totalorder %s19_s26, %s1520_s27  ;;  %p1526_p7 = scmp.lt.s32.totalorder %s1520_s27, %s1520_s27 }
  0x13   :  { %p1527_p8 = por %p1526_p7, %p1525_p6 }
  0x15   :  { %p1528_p9 = pnand %p1527_p8, %p1521_p5 }
  0x17   :  { %1531 = shalt.err (!%p1528_p9)
}
  0x18   :  { %s1582_s28 = smov 384   ;;  %s1583_s29 = smov 24  }
  0x19   :  { %24 = dma.hbm_to_vmem [thread:$0]  %s1643_s0, 768, %s19_s26, [#allocation4], %s1582_s28, %s1582_s28, %s1583_s29  }
  0x1a   :  { %s1584_s7 = smov [#allocation8]  }
  0x1b   :  { %s44_s8 = sshll.u32 %s1584_s7, 4  ;;  %s45_s8 = int_to_ptr.vmem [resolvable:$true] %s44_s8 }
  0x1c   :  { %s1540_s1 = scalar_lea.vmem %s45_s8, 4096  ;;  %p1545_p11 = scmp.lt.s32.totalorder %s45_s8, %s45_s8 }
  0x1d   :  { %p1541_p10 = scmp.ne.s32.totalorder %s45_s8, %s1540_s1  ;;  %p1546_p12 = scmp.lt.s32.totalorder %s1540_s1, %s1540_s1 }
  0x1f   :  { %p1547_p13 = por %p1546_p12, %p1545_p11 }
  0x21   :  { %p1548_p0 = pnand %p1547_p13, %p1541_p10 }
  0x23   :  { %1551 = shalt.err (!%p1548_p0)
}
  0x24   :  { %50 = dma.hbm_to_vmem [thread:$0]  %s1646_s3, 4096, %s45_s8, [#allocation7], %s1579_s21, %s1579_s21, %s1580_s22  }
  0x25   :  { %1572 = dma.done.wait [#allocation4], 768  }
  0x26   :  { %1573 = vsyncadd [#allocation4], 4294966528 }
  0x27   :  { %1574 = dma.done.wait [#allocation7], 16384  }
  0x28   :  { %1575 = vsyncadd [#allocation7], 4294950912  ;;  %v1291_v0 = vld [vmem:[#allocation6 + $0x74] ss:$8 sps:$4 sm:$0xff]   ;;  %v1295_v2 = vld [vmem:[#allocation6 + $0x70] ss:$8 sps:$4 sm:$0xff]  }
  0x29   :  { %v1293_v1 = vld [vmem:[#allocation6 + $0x174] ss:$8 sps:$4 sm:$0xff]   ;;  %686 = vmatprep.subr.bf16.mxu0 %v1291_v0  ;;  %v1296_v3 = vld [vmem:[#allocation6 + $0x170] ss:$8 sps:$4 sm:$0xff]   ;;  %v1297_v4 = vld [vmem:[#allocation6 + $0x64] ss:$8 sps:$4 sm:$0xff]  }
  0x2a   :  { %729 = vmatprep.subr.bf16.mxu1 %v1293_v1  ;;  %687 = vmatpush1.bf16.msra.mxu0 %v1295_v2  ;;  %v1299_v5 = vld [vmem:[#allocation6 + $0x164] ss:$8 sps:$4 sm:$0xff]   ;;  %v1301_v6 = vld [vmem:[#allocation6 + $0x60] ss:$8 sps:$4 sm:$0xff]   ;;  %v1303_v8 = vld [vmem:[#allocation6 + $0x54] ss:$8 sps:$4 sm:$0xff]  }
  0x2b   :  { %730 = vmatpush1.bf16.msra.mxu1 %v1296_v3  ;;  %688 = vmatprep.subr.bf16.mxu0 %v1297_v4  ;;  %v1302_v7 = vld [vmem:[#allocation6 + $0x160] ss:$8 sps:$4 sm:$0xff]   ;;  %v1305_v9 = vld [vmem:[#allocation6 + $0x154] ss:$8 sps:$4 sm:$0xff]   ;;  %v1307_v10 = vld [vmem:[#allocation6 + $0x50] ss:$8 sps:$4 sm:$0xff]  }
  0x2c   :  { %731 = vmatprep.subr.bf16.mxu1 %v1299_v5  ;;  %v1308_v11 = vld [vmem:[#allocation6 + $0x150] ss:$8 sps:$4 sm:$0xff]   ;;  %v1309_v12 = vld [vmem:[#allocation6 + $0x44] ss:$8 sps:$4 sm:$0xff]   ;;  %v1313_v14 = vld [vmem:[#allocation6 + $0x40] ss:$8 sps:$4 sm:$0xff]  }
  0x2d   :  { %v1311_v13 = vld [vmem:[#allocation6 + $0x144] ss:$8 sps:$4 sm:$0xff]   ;;  %v1314_v15 = vld [vmem:[#allocation6 + $0x140] ss:$8 sps:$4 sm:$0xff]   ;;  %v1315_v16 = vld [vmem:[#allocation6 + $0x34] ss:$8 sps:$4 sm:$0xff]  }
  0x2e   :  { %689 = vmatpush1.bf16.msra.mxu0 %v1301_v6  ;;  %v1317_v17 = vld [vmem:[#allocation6 + $0x134] ss:$8 sps:$4 sm:$0xff]   ;;  %v1319_v18 = vld [vmem:[#allocation6 + $0x30] ss:$8 sps:$4 sm:$0xff]   ;;  %v1321_v20 = vld [vmem:[#allocation6 + $0x24] ss:$8 sps:$4 sm:$0xff]  }
  0x2f   :  { %732 = vmatpush1.bf16.msra.mxu1 %v1302_v7  ;;  %690 = vmatprep.subr.bf16.mxu0 %v1303_v8  ;;  %v1320_v19 = vld [vmem:[#allocation6 + $0x130] ss:$8 sps:$4 sm:$0xff]   ;;  %v1323_v21 = vld [vmem:[#allocation6 + $0x124] ss:$8 sps:$4 sm:$0xff]   ;;  %v1325_v22 = vld [vmem:[#allocation6 + $0x20] ss:$8 sps:$4 sm:$0xff]  }
  0x30   :  { %733 = vmatprep.subr.bf16.mxu1 %v1305_v9  ;;  %v1326_v23 = vld [vmem:[#allocation6 + $0x120] ss:$8 sps:$4 sm:$0xff]   ;;  %v1327_v24 = vld [vmem:[#allocation6 + $0x14] ss:$8 sps:$4 sm:$0xff]   ;;  %v1331_v26 = vld [vmem:[#allocation6 + $0x10] ss:$8 sps:$4 sm:$0xff]  }
  0x31   :  { %v1329_v25 = vld [vmem:[#allocation6 + $0x114] ss:$8 sps:$4 sm:$0xff]   ;;  %v1332_v27 = vld [vmem:[#allocation6 + $0x110] ss:$8 sps:$4 sm:$0xff]   ;;  %v1333_v28 = vld [vmem:[#allocation6 + $0x4] ss:$8 sps:$4 sm:$0xff]  }
  0x32   :  { %691 = vmatpush1.bf16.msra.mxu0 %v1307_v10  ;;  %v1335_v29 = vld [vmem:[#allocation6 + $0x104] ss:$8 sps:$4 sm:$0xff]   ;;  %v1337_v30 = vld [vmem:[#allocation6] ss:$8 sps:$4 sm:$0xff]   ;;  %v1339_v32 = vld [vmem:[#allocation6 + $0xf4] ss:$8 sps:$4 sm:$0xff]  }
  0x33   :  { %734 = vmatpush1.bf16.msra.mxu1 %v1308_v11  ;;  %692 = vmatprep.subr.bf16.mxu0 %v1309_v12  ;;  %v1338_v31 = vld [vmem:[#allocation6 + $0x100] ss:$8 sps:$4 sm:$0xff]   ;;  %v1341_v33 = vld [vmem:[#allocation6 + $0x1f4] ss:$8 sps:$4 sm:$0xff]   ;;  %v1343_v34 = vld [vmem:[#allocation6 + $0xf0] ss:$8 sps:$4 sm:$0xff]  }
  0x34   :  { %735 = vmatprep.subr.bf16.mxu1 %v1311_v13  ;;  %v1344_v35 = vld [vmem:[#allocation6 + $0x1f0] ss:$8 sps:$4 sm:$0xff]   ;;  %v1345_v36 = vld [vmem:[#allocation6 + $0xe4] ss:$8 sps:$4 sm:$0xff]   ;;  %v1349_v38 = vld [vmem:[#allocation6 + $0xe0] ss:$8 sps:$4 sm:$0xff]  }
  0x35   :  { %v1347_v37 = vld [vmem:[#allocation6 + $0x1e4] ss:$8 sps:$4 sm:$0xff]   ;;  %v1350_v39 = vld [vmem:[#allocation6 + $0x1e0] ss:$8 sps:$4 sm:$0xff]   ;;  %v1351_v40 = vld [vmem:[#allocation6 + $0xd4] ss:$8 sps:$4 sm:$0xff]  }
  0x36   :  { %693 = vmatpush1.bf16.msra.mxu0 %v1313_v14  ;;  %v1353_v41 = vld [vmem:[#allocation6 + $0x1d4] ss:$8 sps:$4 sm:$0xff]   ;;  %v1355_v42 = vld [vmem:[#allocation6 + $0xd0] ss:$8 sps:$4 sm:$0xff]   ;;  %v1357_v44 = vld [vmem:[#allocation6 + $0xc4] ss:$8 sps:$4 sm:$0xff]  }
  0x37   :  { %736 = vmatpush1.bf16.msra.mxu1 %v1314_v15  ;;  %694 = vmatprep.subr.bf16.mxu0 %v1315_v16  ;;  %v1356_v43 = vld [vmem:[#allocation6 + $0x1d0] ss:$8 sps:$4 sm:$0xff]   ;;  %v1359_v45 = vld [vmem:[#allocation6 + $0x1c4] ss:$8 sps:$4 sm:$0xff]   ;;  %v1361_v46 = vld [vmem:[#allocation6 + $0xc0] ss:$8 sps:$4 sm:$0xff]  }
  0x38   :  { %737 = vmatprep.subr.bf16.mxu1 %v1317_v17  ;;  %v1362_v47 = vld [vmem:[#allocation6 + $0x1c0] ss:$8 sps:$4 sm:$0xff]   ;;  %v1363_v48 = vld [vmem:[#allocation6 + $0xb4] ss:$8 sps:$4 sm:$0xff]   ;;  %v1367_v52 = vld [vmem:[#allocation6 + $0xb0] ss:$8 sps:$4 sm:$0xff]  }
  0x39   :  { %v1389_v49 = vld [vmem:[#allocation3 + $0x4] ss:$24 sps:$4 sm:$0xff]   ;;  %v1368_v53 = vld [vmem:[#allocation6 + $0x1b0] ss:$8 sps:$4 sm:$0xff]   ;;  %v1373_v56 = vld [vmem:[#allocation6 + $0xa0] ss:$8 sps:$4 sm:$0xff]  }
  0x3a   :  { %695 = vmatpush1.bf16.msra.mxu0 %v1319_v18  ;;  %v1365_v50 = vld [vmem:[#allocation6 + $0x1b4] ss:$8 sps:$4 sm:$0xff]   ;;  %718 = vmatprep.mubr.bf16.mxu0 %v1389_v49  ;;  %v1369_v54 = vld [vmem:[#allocation6 + $0xa4] ss:$8 sps:$4 sm:$0xff]   ;;  %v1374_v57 = vld [vmem:[#allocation6 + $0x1a0] ss:$8 sps:$4 sm:$0xff]  }
  0x3b   :  { %738 = vmatpush1.bf16.msra.mxu1 %v1320_v19  ;;  %696 = vmatprep.subr.bf16.mxu0 %v1321_v20  ;;  %v1392_v51 = vld [vmem:[#allocation3 + $0xc] ss:$24 sps:$4 sm:$0xff]   ;;  %v1371_v55 = vld [vmem:[#allocation6 + $0x1a4] ss:$8 sps:$4 sm:$0xff]   ;;  %v1379_v60 = vld [vmem:[#allocation6 + $0x90] ss:$8 sps:$4 sm:$0xff]  }
  0x3c   :  { %739 = vmatprep.subr.bf16.mxu1 %v1323_v21  ;;  %761 = vmatprep.mubr.bf16.mxu1 %v1392_v51  ;;  %v1375_v58 = vld [vmem:[#allocation6 + $0x94] ss:$8 sps:$4 sm:$0xff]   ;;  %v1380_v61 = vld [vmem:[#allocation6 + $0x190] ss:$8 sps:$4 sm:$0xff]   ;;  %v1381_v62 = vld [vmem:[#allocation6 + $0x84] ss:$8 sps:$4 sm:$0xff]  }
  0x3d   :  { %v1377_v59 = vld [vmem:[#allocation6 + $0x194] ss:$8 sps:$4 sm:$0xff]   ;;  %v1383_v63 = vld [vmem:[#allocation6 + $0x184] ss:$8 sps:$4 sm:$0xff]   ;;  %v1385_v0 = vld [vmem:[#allocation6 + $0x80] ss:$8 sps:$4 sm:$0xff]  }
  0x3e   :  { %697 = vmatpush1.bf16.msra.mxu0 %v1325_v22  ;;  %v1386_v1 = vld [vmem:[#allocation6 + $0x180] ss:$8 sps:$4 sm:$0xff]   ;;  %v1395_v2 = vld [vmem:[#allocation6 + $0x274] ss:$8 sps:$4 sm:$0xff]   ;;  %v1390_v4 = vld [vmem:[#allocation3 + $0x8] ss:$24 sps:$4 sm:$0xff]  }
  0x3f   :  { %740 = vmatpush1.bf16.msra.mxu1 %v1326_v23  ;;  %698 = vmatprep.subr.bf16.mxu0 %v1327_v24  ;;  %v1387_v3 = vld [vmem:[#allocation3] ss:$24 sps:$4 sm:$0xff]   ;;  %v1398_v6 = vld [vmem:[#allocation6 + $0x264] ss:$8 sps:$4 sm:$0xff]   ;;  %v1401_v8 = vld [vmem:[#allocation6 + $0x254] ss:$8 sps:$4 sm:$0xff]  }
  0x40   :  { %741 = vmatprep.subr.bf16.mxu1 %v1329_v25  ;;  %v1393_v5 = vld [vmem:[#allocation6 + $0x270] ss:$8 sps:$4 sm:$0xff]   ;;  %v1396_v7 = vld [vmem:[#allocation6 + $0x260] ss:$8 sps:$4 sm:$0xff]   ;;  %v1443_v9 = vld [vmem:[#allocation3 + $0x14] ss:$24 sps:$4 sm:$0xff]  }
  0x41   :  { %v1399_v10 = vld [vmem:[#allocation6 + $0x250] ss:$8 sps:$4 sm:$0xff]   ;;  %v1404_v11 = vld [vmem:[#allocation6 + $0x244] ss:$8 sps:$4 sm:$0xff]   ;;  %v1402_v12 = vld [vmem:[#allocation6 + $0x240] ss:$8 sps:$4 sm:$0xff]  }
  0x42   :  { %699 = vmatpush1.bf16.msra.mxu0 %v1331_v26  ;;  %v1407_v13 = vld [vmem:[#allocation6 + $0x234] ss:$8 sps:$4 sm:$0xff]   ;;  %v1405_v14 = vld [vmem:[#allocation6 + $0x230] ss:$8 sps:$4 sm:$0xff]   ;;  %v1410_v15 = vld [vmem:[#allocation6 + $0x224] ss:$8 sps:$4 sm:$0xff]  }
  0x43   :  { %742 = vmatpush1.bf16.msra.mxu1 %v1332_v27  ;;  %700 = vmatprep.subr.bf16.mxu0 %v1333_v28  ;;  %v1408_v16 = vld [vmem:[#allocation6 + $0x220] ss:$8 sps:$4 sm:$0xff]   ;;  %v1413_v17 = vld [vmem:[#allocation6 + $0x214] ss:$8 sps:$4 sm:$0xff]   ;;  %v1411_v18 = vld [vmem:[#allocation6 + $0x210] ss:$8 sps:$4 sm:$0xff]  }
  0x44   :  { %743 = vmatprep.subr.bf16.mxu1 %v1335_v29  ;;  %v1416_v19 = vld [vmem:[#allocation6 + $0x204] ss:$8 sps:$4 sm:$0xff]   ;;  %v1414_v20 = vld [vmem:[#allocation6 + $0x200] ss:$8 sps:$4 sm:$0xff]   ;;  %v1419_v21 = vld [vmem:[#allocation6 + $0x2f4] ss:$8 sps:$4 sm:$0xff]  }
  0x45   :  { %v1417_v22 = vld [vmem:[#allocation6 + $0x2f0] ss:$8 sps:$4 sm:$0xff]   ;;  %v1422_v23 = vld [vmem:[#allocation6 + $0x2e4] ss:$8 sps:$4 sm:$0xff]   ;;  %v1420_v24 = vld [vmem:[#allocation6 + $0x2e0] ss:$8 sps:$4 sm:$0xff]  }
  0x46   :  { %701 = vmatpush1.bf16.msra.mxu0 %v1337_v30  ;;  %v1425_v25 = vld [vmem:[#allocation6 + $0x2d4] ss:$8 sps:$4 sm:$0xff]   ;;  %v1423_v26 = vld [vmem:[#allocation6 + $0x2d0] ss:$8 sps:$4 sm:$0xff]   ;;  %v1428_v27 = vld [vmem:[#allocation6 + $0x2c4] ss:$8 sps:$4 sm:$0xff]  }
  0x47   :  { %744 = vmatpush1.bf16.msra.mxu1 %v1338_v31  ;;  %702 = vmatprep.subr.bf16.mxu0 %v1339_v32  ;;  %v1426_v28 = vld [vmem:[#allocation6 + $0x2c0] ss:$8 sps:$4 sm:$0xff]   ;;  %v1431_v29 = vld [vmem:[#allocation6 + $0x2b4] ss:$8 sps:$4 sm:$0xff]   ;;  %v1429_v30 = vld [vmem:[#allocation6 + $0x2b0] ss:$8 sps:$4 sm:$0xff]  }
  0x48   :  { %745 = vmatprep.subr.bf16.mxu1 %v1341_v33  ;;  %v1434_v31 = vld [vmem:[#allocation6 + $0x2a4] ss:$8 sps:$4 sm:$0xff]   ;;  %v1432_v32 = vld [vmem:[#allocation6 + $0x2a0] ss:$8 sps:$4 sm:$0xff]   ;;  %v1437_v33 = vld [vmem:[#allocation6 + $0x294] ss:$8 sps:$4 sm:$0xff]  }
  0x49   :  { %v1459_v49 = vld [vmem:[#allocation8 + $0x20] ss:$8 sps:$4 sm:$0xff]   ;;  %v1462_v51 = vld [vmem:[#allocation8 + $0x10] ss:$8 sps:$4 sm:$0xff]   ;;  %s1585_s12 = smov [#allocation9]  }
  0x4a   :  { %703 = vmatpush2.bf16.msra.mxu0 %v1343_v34  ;;  %v1435_v34 = vld [vmem:[#allocation6 + $0x290] ss:$8 sps:$4 sm:$0xff]   ;;  %s1132_s13 = sshll.u32 %s1585_s12, 4  ;;  %s1133_s13 = int_to_ptr.vmem [resolvable:$true] %s1132_s13 }
  0x4b   :  { %746 = vmatpush2.bf16.msra.mxu1 %v1344_v35  ;;  %704 = vmatprep.subr.bf16.mxu0 %v1345_v36  ;;  %v1440_v35 = vld [vmem:[#allocation6 + $0x284] ss:$8 sps:$4 sm:$0xff]   ;;  %v1438_v36 = vld [vmem:[#allocation6 + $0x280] ss:$8 sps:$4 sm:$0xff]   ;;  %p1557_p2 = scmp.lt.s32.totalorder %s1133_s13, %s1133_s13 }
  0x4c   :  { %747 = vmatprep.subr.bf16.mxu1 %v1347_v37  ;;  %v1441_v37 = vld [vmem:[#allocation3 + $0x10] ss:$24 sps:$4 sm:$0xff]  }
  0x4e   :  { %705 = vmatpush2.bf16.msra.mxu0 %v1349_v38  ;;  %v1444_v38 = vld [vmem:[#allocation8 + $0x70] ss:$8 sps:$4 sm:$0xff]  }
  0x4f   :  { %748 = vmatpush2.bf16.msra.mxu1 %v1350_v39  ;;  %706 = vmatprep.subr.bf16.mxu0 %v1351_v40  ;;  %v1446_v39 = vld [vmem:[#allocation8 + $0x74] ss:$8 sps:$4 sm:$0xff]   ;;  %v1449_v40 = vld [vmem:[#allocation8 + $0x64] ss:$8 sps:$4 sm:$0xff]  }
  0x50   :  { %749 = vmatprep.subr.bf16.mxu1 %v1353_v41  ;;  %v1447_v41 = vld [vmem:[#allocation8 + $0x60] ss:$8 sps:$4 sm:$0xff]  }
  0x52   :  { %707 = vmatpush2.bf16.msra.mxu0 %v1355_v42  ;;  %v1452_v42 = vld [vmem:[#allocation8 + $0x54] ss:$8 sps:$4 sm:$0xff]  }
  0x53   :  { %750 = vmatpush2.bf16.msra.mxu1 %v1356_v43  ;;  %708 = vmatprep.subr.bf16.mxu0 %v1357_v44  ;;  %v1450_v43 = vld [vmem:[#allocation8 + $0x50] ss:$8 sps:$4 sm:$0xff]   ;;  %v1455_v44 = vld [vmem:[#allocation8 + $0x44] ss:$8 sps:$4 sm:$0xff]  }
  0x54   :  { %751 = vmatprep.subr.bf16.mxu1 %v1359_v45  ;;  %v1453_v45 = vld [vmem:[#allocation8 + $0x40] ss:$8 sps:$4 sm:$0xff]  }
  0x56   :  { %709 = vmatpush2.bf16.msra.mxu0 %v1361_v46  ;;  %v1458_v46 = vld [vmem:[#allocation8 + $0x34] ss:$8 sps:$4 sm:$0xff]  }
  0x57   :  { %752 = vmatpush2.bf16.msra.mxu1 %v1362_v47  ;;  %710 = vmatprep.subr.bf16.mxu0 %v1363_v48  ;;  %v1456_v47 = vld [vmem:[#allocation8 + $0x30] ss:$8 sps:$4 sm:$0xff]   ;;  %v1461_v48 = vld [vmem:[#allocation8 + $0x24] ss:$8 sps:$4 sm:$0xff]  }
  0x58   :  { %753 = vmatprep.subr.bf16.mxu1 %v1365_v50  ;;  %v1464_v50 = vld [vmem:[#allocation8 + $0x14] ss:$8 sps:$4 sm:$0xff]  }
  0x5a   :  { %711 = vmatpush2.bf16.msra.mxu0 %v1367_v52  ;;  %v1467_v52 = vld [vmem:[#allocation8 + $0x4] ss:$8 sps:$4 sm:$0xff]  }
  0x5b   :  { %754 = vmatpush2.bf16.msra.mxu1 %v1368_v53  ;;  %712 = vmatprep.subr.bf16.mxu0 %v1369_v54  ;;  %v1465_v53 = vld [vmem:[#allocation8] ss:$8 sps:$4 sm:$0xff]   ;;  %v1470_v54 = vld [vmem:[#allocation8 + $0xf4] ss:$8 sps:$4 sm:$0xff]  }
  0x5c   :  { %755 = vmatprep.subr.bf16.mxu1 %v1371_v55  ;;  %v1468_v55 = vld [vmem:[#allocation8 + $0xf0] ss:$8 sps:$4 sm:$0xff]  }
  0x5e   :  { %713 = vmatpush2.bf16.msra.mxu0 %v1373_v56  ;;  %v1473_v56 = vld [vmem:[#allocation8 + $0xe4] ss:$8 sps:$4 sm:$0xff]  }
  0x5f   :  { %756 = vmatpush2.bf16.msra.mxu1 %v1374_v57  ;;  %714 = vmatprep.subr.bf16.mxu0 %v1375_v58  ;;  %v1471_v57 = vld [vmem:[#allocation8 + $0xe0] ss:$8 sps:$4 sm:$0xff]   ;;  %v1476_v58 = vld [vmem:[#allocation8 + $0xd4] ss:$8 sps:$4 sm:$0xff]  }
  0x60   :  { %757 = vmatprep.subr.bf16.mxu1 %v1377_v59  ;;  %v1474_v59 = vld [vmem:[#allocation8 + $0xd0] ss:$8 sps:$4 sm:$0xff]  }
  0x62   :  { %715 = vmatpush2.bf16.msra.mxu0 %v1379_v60  ;;  %v1479_v60 = vld [vmem:[#allocation8 + $0xc4] ss:$8 sps:$4 sm:$0xff]  }
  0x63   :  { %758 = vmatpush2.bf16.msra.mxu1 %v1380_v61  ;;  %716 = vmatprep.subr.bf16.mxu0 %v1381_v62  ;;  %v1477_v61 = vld [vmem:[#allocation8 + $0xc0] ss:$8 sps:$4 sm:$0xff]   ;;  %v1482_v62 = vld [vmem:[#allocation8 + $0xb4] ss:$8 sps:$4 sm:$0xff]  }
  0x64   :  { %759 = vmatprep.subr.bf16.mxu1 %v1383_v63  ;;  %v1480_v63 = vld [vmem:[#allocation8 + $0xb0] ss:$8 sps:$4 sm:$0xff]  }
  0x66   :  { %717 = vmatpush2.bf16.msra.mxu0 %v1385_v0  ;;  %v1485_v0 = vld [vmem:[#allocation8 + $0xa4] ss:$8 sps:$4 sm:$0xff]  }
  0x67   :  { %760 = vmatpush2.bf16.msra.mxu1 %v1386_v1  ;;  %772 = vmatprep.subr.bf16.mxu0 %v1395_v2  ;;  %v1483_v1 = vld [vmem:[#allocation8 + $0xa0] ss:$8 sps:$4 sm:$0xff]   ;;  %v1488_v2 = vld [vmem:[#allocation8 + $0x94] ss:$8 sps:$4 sm:$0xff]  }
  0x68   :  { %1070 = vmatprep.subr.bf16.mxu1 %v1446_v39 }
  0x69   :  { %719 = vmatmul.mubr.bf16.vlgmr.msra.gmra.mxu0 %v1387_v3  ;;  %v1486_v3 = vld [vmem:[#allocation8 + $0x90] ss:$8 sps:$4 sm:$0xff]  }
  0x6a   :  { %762 = vmatmul.mubr.bf16.vlgmr.msra.gmra.mxu1 %v1390_v4  ;;  %773 = vmatpush1.bf16.msra.mxu0 %v1393_v5  ;;  %v1491_v4 = vld [vmem:[#allocation8 + $0x84] ss:$8 sps:$4 sm:$0xff]   ;;  %v1489_v5 = vld [vmem:[#allocation8 + $0x80] ss:$8 sps:$4 sm:$0xff]  }
  0x6b   :  { %774 = vmatprep.subr.bf16.mxu0 %v1398_v6  ;;  %804 = vmatprep.mubr.bf16.mxu0 %v1443_v9  ;;  %v833_v9 = vlaneseq }
  0x6c   :  { %1071 = vmatpush1.bf16.msra.mxu1 %v1444_v38 }
  0x6d   :  { %1072 = vmatprep.subr.bf16.mxu1 %v1449_v40 }
  0x6e   :  { %775 = vmatpush1.bf16.msra.mxu0 %v1396_v7 }
  0x6f   :  { %776 = vmatprep.subr.bf16.mxu0 %v1401_v8 }
  0x70   :  { %1073 = vmatpush1.bf16.msra.mxu1 %v1447_v41 }
  0x71   :  { %1074 = vmatprep.subr.bf16.mxu1 %v1452_v42  ;;  %v889_v42 = vld [vmem:[%s1647_s4] sm:$0x3]  ;;  %s1552_s4 = scalar_lea.vmem %s1133_s13, 256 }
  0x72   :  { %777 = vmatpush1.bf16.msra.mxu0 %v1399_v10  ;;  %p1553_p1 = scmp.ne.s32.totalorder %s1133_s13, %s1552_s4  ;;  %p1558_p3 = scmp.lt.s32.totalorder %s1552_s4, %s1552_s4 }
  0x73   :  { %778 = vmatprep.subr.bf16.mxu0 %v1404_v11 }
  0x74   :  { %1075 = vmatpush1.bf16.msra.mxu1 %v1450_v43  ;;  %v890_v43 = vunpack.c.l.bf16 %v889_v42  ;;  %p1559_p4 = por %p1558_p3, %p1557_p2 }
  0x75   :  { %1076 = vmatprep.subr.bf16.mxu1 %v1455_v44 }
  0x76   :  { %779 = vmatpush1.bf16.msra.mxu0 %v1402_v12  ;;  %v834_v12 = vshrl.u32 %v833_v9, 7  ;;  %p1560_p5 = pnand %p1559_p4, %p1553_p1 }
  0x77   :  { %780 = vmatprep.subr.bf16.mxu0 %v1407_v13  ;;  %v830_v13 = vld [vmem:[%s1645_s2] sm:$0x3] }
  0x78   :  { %1077 = vmatpush1.bf16.msra.mxu1 %v1453_v45 }
  0x79   :  { %1078 = vmatprep.subr.bf16.mxu1 %v1458_v46 }
  0x7a   :  { %781 = vmatpush1.bf16.msra.mxu0 %v1405_v14  ;;  %v839_v14 = vsub.s32 2, %v834_v12 }
  0x7b   :  { %782 = vmatprep.subr.bf16.mxu0 %v1410_v15 }
  0x7c   :  { %1079 = vmatpush1.bf16.msra.mxu1 %v1456_v47  ;;  %v899_v45 = vrot.slane %v890_v43, %v839_v14 }
  0x7d   :  { %1080 = vmatprep.subr.bf16.mxu1 %v1461_v48 }
  0x7e   :  { %783 = vmatpush1.bf16.msra.mxu0 %v1408_v16 }
  0x7f   :  { %784 = vmatprep.subr.bf16.mxu0 %v1413_v17  ;;  %v831_v17 = vunpack.c.l.bf16 %v830_v13 }
  0x80   :  { %1081 = vmatpush1.bf16.msra.mxu1 %v1459_v49 }
  0x81   :  { %1082 = vmatprep.subr.bf16.mxu1 %v1464_v50 }
  0x82   :  { %785 = vmatpush1.bf16.msra.mxu0 %v1411_v18  ;;  %v835_v18 = vsub.s32 0, %v834_v12 }
  0x83   :  { %786 = vmatprep.subr.bf16.mxu0 %v1416_v19 }
  0x84   :  { %1083 = vmatpush1.bf16.msra.mxu1 %v1462_v51  ;;  %v895_v44 = vrot.slane %v890_v43, %v835_v18  ;;  %v909_v47 = vrot.slane %v899_v45, %v835_v18 }
  0x85   :  { %1084 = vmatprep.subr.bf16.mxu1 %v1467_v52 }
  0x86   :  { %787 = vmatpush1.bf16.msra.mxu0 %v1414_v20  ;;  %v840_v20 = vrot.slane %v831_v17, %v839_v14  ;;  %v905_v46 = vrot.slane %v895_v44, %v835_v18 }
  0x87   :  { %788 = vmatprep.subr.bf16.mxu0 %v1419_v21 }
  0x88   :  { %1085 = vmatpush1.bf16.msra.mxu1 %v1465_v53 }
  0x89   :  { %1086 = vmatprep.subr.bf16.mxu1 %v1470_v54 }
  0x8a   :  { %789 = vmatpush2.bf16.msra.mxu0 %v1417_v22  ;;  %v836_v22 = vrot.slane %v831_v17, %v835_v18 }
  0x8b   :  { %790 = vmatprep.subr.bf16.mxu0 %v1422_v23 }
  0x8c   :  { %1087 = vmatpush2.bf16.msra.mxu1 %v1468_v55 }
  0x8d   :  { %1088 = vmatprep.subr.bf16.mxu1 %v1473_v56 }
  0x8e   :  { %791 = vmatpush2.bf16.msra.mxu0 %v1420_v24 }
  0x8f   :  { %792 = vmatprep.subr.bf16.mxu0 %v1425_v25 }
  0x90   :  { %1089 = vmatpush2.bf16.msra.mxu1 %v1471_v57 }
  0x91   :  { %1090 = vmatprep.subr.bf16.mxu1 %v1476_v58 }
  0x92   :  { %793 = vmatpush2.bf16.msra.mxu0 %v1423_v26 }
  0x93   :  { %794 = vmatprep.subr.bf16.mxu0 %v1428_v27 }
  0x94   :  { %1091 = vmatpush2.bf16.msra.mxu1 %v1474_v59 }
  0x95   :  { %1092 = vmatprep.subr.bf16.mxu1 %v1479_v60 }
  0x96   :  { %795 = vmatpush2.bf16.msra.mxu0 %v1426_v28 }
  0x97   :  { %796 = vmatprep.subr.bf16.mxu0 %v1431_v29 }
  0x98   :  { %1093 = vmatpush2.bf16.msra.mxu1 %v1477_v61 }
  0x99   :  { %1094 = vmatprep.subr.bf16.mxu1 %v1482_v62 }
  0x9a   :  { %797 = vmatpush2.bf16.msra.mxu0 %v1429_v30  ;;  %v850_v30 = vrot.slane %v840_v20, %v835_v18 }
  0x9b   :  { %798 = vmatprep.subr.bf16.mxu0 %v1434_v31 }
  0x9c   :  { %1095 = vmatpush2.bf16.msra.mxu1 %v1480_v63 }
  0x9d   :  { %1096 = vmatprep.subr.bf16.mxu1 %v1485_v0 }
  0x9e   :  { %799 = vmatpush2.bf16.msra.mxu0 %v1432_v32 }
  0x9f   :  { %800 = vmatprep.subr.bf16.mxu0 %v1437_v33  ;;  %v846_v33 = vrot.slane %v836_v22, %v835_v18 }
  0xa0   :  { %1097 = vmatpush2.bf16.msra.mxu1 %v1483_v1 }
  0xa1   :  { %1098 = vmatprep.subr.bf16.mxu1 %v1488_v2 }
  0xa2   :  { %801 = vmatpush2.bf16.msra.mxu0 %v1435_v34 }
  0xa3   :  { %802 = vmatprep.subr.bf16.mxu0 %v1440_v35 }
  0xa4   :  { %1099 = vmatpush2.bf16.msra.mxu1 %v1486_v3 }
  0xa5   :  { %1100 = vmatprep.subr.bf16.mxu1 %v1491_v4 }
  0xa6   :  { %803 = vmatpush2.bf16.msra.mxu0 %v1438_v36 }
  0xa8   :  { %1101 = vmatpush2.bf16.msra.mxu1 %v1489_v5 }
  0xa9   :  { %805 = vmatmul.mubr.bf16.vlgmr.msra.gmra.mxu0 %v1441_v37 }
 0x129   :  { %v720_v6 = vpop.f32.mrf.mxu0 }
 0x12a   :  { %v763_v7 = vpop.f32.mrf.mxu1 }
 0x12b   :  { %v722_v8 = vpop.f32.mrf.mxu0  ;;  %v764_v26 = vadd.f32 %v763_v7, %v720_v6 }
 0x12c   :  { %v765_v10 = vpop.f32.mrf.mxu1 }
 0x12d   :  { %v724_v11 = vpop.f32.mrf.mxu0  ;;  %v766_v24 = vadd.f32 %v765_v10, %v722_v8 }
 0x12e   :  { %v767_v15 = vpop.f32.mrf.mxu1 }
 0x12f   :  { %v726_v16 = vpop.f32.mrf.mxu0  ;;  %v768_v25 = vadd.f32 %v767_v15, %v724_v11 }
 0x130   :  { %v769_v21 = vpop.f32.mrf.mxu1 }
 0x131   :  { %v770_v28 = vadd.f32 %v769_v21, %v726_v16 }
 0x169   :  { %v806_v19 = vpop.f32.mrf.mxu0 }
 0x16a   :  { %v807_v32 = vadd.f32 %v806_v19, %v764_v26 }
 0x16b   :  { %v808_v23 = vpop.f32.mrf.mxu0 }
 0x16c   :  { %v809_v29 = vadd.f32 %v808_v23, %v766_v24  ;;  %v851_v39 = vadd.f32 %v846_v33, %v807_v32 }
 0x16d   :  { %v810_v27 = vpop.f32.mrf.mxu0 }
 0x16e   :  { %v811_v31 = vadd.f32 %v810_v27, %v768_v25  ;;  %v852_v37 = vadd.f32 %v850_v30, %v809_v29 }
 0x16f   :  { %v812_v34 = vpop.f32.mrf.mxu0 }
 0x170   :  { %v813_v35 = vadd.f32 %v812_v34, %v770_v28  ;;  %v853_v36 = vadd.f32 %v846_v33, %v811_v31 }
 0x172   :  { %v854_v38 = vadd.f32 %v850_v30, %v813_v35  ;;  %v855_v41 = vpack.c.bf16 %v853_v36, %v851_v39 }
 0x174   :  { %v856_v40 = vpack.c.bf16 %v854_v38, %v852_v37 }
 0x176   :  { %1102 = vmatprep.mubr.bf16.mxu1 %v856_v40 }
 0x177   :  { %1103 = vmatmul.mubr.bf16.vlgmr.msra.gmra.mxu1 %v855_v41 }
 0x237   :  { %v1104_v48 = vpop.f32.mrf.mxu1 }
 0x238   :  { %v1105_v50 = vadd.f32 %v1104_v48, %v905_v46 }
 0x239   :  { %v1106_v49 = vpop.f32.mrf.mxu1 }
 0x23a   :  { %v1107_v51 = vadd.f32 %v1106_v49, %v909_v47 }
 0x23b   :  { %v1108_v52 = vpop.f32.mrf.mxu1 }
 0x23c   :  { %v1281_v53 = vpack.c.bf16 %v1107_v51, %v1105_v50  ;;  %v1109_v55 = vadd.f32 %v1108_v52, %v905_v46 }
 0x23d   :  { %v1110_v54 = vpop.f32.mrf.mxu1 }
 0x23e   :  { %1125 = vst [vmem:[#allocation9] sm:$0xff] %v1281_v53  ;;  %v1111_v56 = vadd.f32 %v1110_v54, %v909_v47 }
 0x240   :  { %v1282_v57 = vpack.c.bf16 %v1111_v56, %v1109_v55 }
 0x242   :  { %1126 = vst [vmem:[#allocation9 + $0x8] sm:$0xff] %v1282_v57 }
 0x243   :  { %1563 = shalt.err (!%p1560_p5)
}
 0x244   :  { %1138 = dma.vmem_to_hbm [thread:$0]  %s1133_s13, 256, %s1648_s5, [#allocation5], %s1579_s21, %s1579_s21, %s1580_s22  }
 0x245   :  { %1576 = dma.done.wait [#allocation5], 256  }
 0x246   :  { %1577 = vsyncadd [#allocation5], 4294967040 }
 0x247   :  { %1142 = vsyncpa [#allocation4], 1 }
 0x248   :  { %1143 = vsyncpa [#allocation7], 1 }
 0x249   :  { %1144 = vsyncpa [#allocation5], 1 }

</bundles_post_ra>
